<compile_context>
chip_gen: v7x
topology: tpu7x:2x2x1
jax: 0.10.0
libtpu: 0.0.40
codegen_flags: <defaults>
</compile_context>

<pallas_src>
import jax
import jax.numpy as jnp
from jax.experimental import pallas as pl
from jax.experimental.pallas import tpu as pltpu


def _attention_gate_kernel(x_ref, params_ref, bpsi_ref, o_ref):
    """One (batch, spatial-tile) step.

    x_ref     : (1, Cin, TS)      input pixels, channels on sublanes, pixels on lanes
    params_ref: (Cout, Cin + 2)   [ W_sum | b_sum | w_psi ]   (VMEM, tiny, block-invariant)
    bpsi_ref  : (1,)              psi bias (SMEM scalar)
    o_ref     : (1, Cin, TS)      gated output x * sigmoid(psi)
    """
    c_in = x_ref.shape[1]
    x = x_ref[0]                                              # (Cin, TS), lanes = TS

    w_sum = params_ref[:, :c_in]                              # (Cout, Cin)
    b_sum = params_ref[:, c_in:c_in + 1]                      # (Cout, 1)
    w_psi = params_ref[:, c_in + 1:c_in + 2]                  # (Cout, 1)

    # ReLU(theta + phi) == ReLU(W_sum @ x + b_sum)  (theta/phi folded host-side)
    f = jnp.maximum(
        jnp.dot(w_sum, x, preferred_element_type=jnp.float32) + b_sum, 0.0)   # (Cout, TS)

    # psi = 1x1 conv Cout -> 1: broadcast-multiply + sublane reduction (XLU);
    # keeps the lane axis dense and avoids a degenerate M=1 matmul.
    psi = jnp.sum(f * w_psi, axis=0, keepdims=True) + bpsi_ref[0]              # (1, TS)

    # sigmoid via EUP exp + reciprocal (exact reciprocal: kernel is HBM-bound,
    # and the output is checked against the f32 reference at 1e-5).
    coef = pl.reciprocal(1.0 + jnp.exp(-psi))                                  # (1, TS)

    o_ref[0] = (x * coef).astype(o_ref.dtype)                 # broadcast over channels


def _ceil_to(v, m):
    return -(-v // m) * m


def _vmem_bytes_per_lane(c_in, c_out):
    """Per-lane f32 bytes of pipelined + transient VMEM buffers.

    Counts the (1, Cin, ts) input/output blocks at ceil(Cin/8)*8 sublanes (VMEM
    sublane padding; Cin is NOT padded in HBM), x2 for double-buffering each, plus
    the (Cout, ts) f intermediate and the (1 -> 8 sublane) psi/coef row.
    """
    sub_in = _ceil_to(c_in, 8)
    sub_out = _ceil_to(c_out, 8)
    return 4 * (2 * sub_in + 2 * sub_in + sub_out + 8)


def _pick_lane_tile(hw, c_in, c_out, n, vmem_budget_bytes=20 << 20):
    """Pick the spatial (lane) tile and the (padded) total lane extent.

    ts is the largest multiple of 128 whose pipelined footprint fits the VMEM
    budget (~20 MiB -> well under v7x's 32 MiB scoped default / 64 MiB physical,
    and under the 32 MiB vmem_limit_bytes we request for v5e).  H*W is padded up
    to a multiple of ts so every block is lane-dense.  A spatial split is forced
    only when batch == 1, so v7x's two TensorCores both get work without adding
    per-step overhead at batch >= 2.
    """
    hw128 = _ceil_to(hw, 128)
    ts_max = max(128, (vmem_budget_bytes // _vmem_bytes_per_lane(c_in, c_out)) // 128 * 128)
    if hw128 <= ts_max:
        ts, n_tiles = hw128, 1
    else:
        n_tiles = -(-hw128 // ts_max)
        ts = _ceil_to(-(-hw128 // n_tiles), 128)
    if n == 1 and n_tiles == 1 and ts >= 256:
        ts = _ceil_to(ts // 2, 128)
        n_tiles = 2
    return ts, ts * n_tiles


def prepare_kernel_params(torch_params):
    """One-time host-side transform from PyTorch Conv2d layouts to kernel layout.

    Folds theta+phi (W_sum = W_th + W_ph, b_sum = b_th + b_ph) and packs
    [W_sum | b_sum | w_psi] into a single (Cout, Cin+2) array; psi bias stays a
    separate (1,) scalar destined for SMEM.
    """
    w_th, b_th, w_ph, b_ph, w_ps, b_ps = torch_params
    c_out, c_in = w_th.shape[0], w_th.shape[1]
    w_sum = (w_th + w_ph).reshape(c_out, c_in).astype(jnp.float32)
    b_sum = (b_th + b_ph).reshape(c_out, 1).astype(jnp.float32)
    w_psi = w_ps.reshape(c_out, 1).astype(jnp.float32)     # (1,Cout,1,1) -> (Cout,1)
    packed = jnp.concatenate([w_sum, b_sum, w_psi], axis=1)  # (Cout, Cin+2)
    b_psi = b_ps.reshape(1).astype(jnp.float32)              # (1,) SMEM scalar
    return packed, b_psi


def attention_gate_forward(x_nchw, g_nchw, kparams):
    """AttentionGate.forward.  x, g: (N, Cin, H, W).  Returns x * coef_att."""
    del g_nchw  # the original forward applies phi_g to x, so g is unused.
    params, b_psi = kparams
    c_out = params.shape[0]
    n, c_in, h, w = x_nchw.shape
    assert params.shape[1] == c_in + 2

    hw = h * w
    ts, hw_final = _pick_lane_tile(hw, c_in, c_out, n)

    x3 = x_nchw.reshape(n, c_in, hw)          # contiguous reshape: lane axis = H*W
    if hw_final != hw:
        # pad lanes up to a multiple of ts (lane-dense blocks, no masked stores)
        x3 = jnp.pad(x3, ((0, 0), (0, 0), (0, hw_final - hw)))

    out = pl.pallas_call(
        _attention_gate_kernel,
        out_shape=jax.ShapeDtypeStruct((n, c_in, hw_final), x_nchw.dtype),
        grid_spec=pltpu.PrefetchScalarGridSpec(
            num_scalar_prefetch=0,
            grid=(n, hw_final // ts),
            in_specs=[
                pl.BlockSpec((1, c_in, ts), lambda b, s: (b, 0, s)),
                pl.BlockSpec((c_out, c_in + 2), lambda b, s: (0, 0)),
                pl.BlockSpec(memory_space=pltpu.MemorySpace.SMEM),
            ],
            out_specs=pl.BlockSpec((1, c_in, ts), lambda b, s: (b, 0, s)),
        ),
        compiler_params=pltpu.CompilerParams(
            dimension_semantics=("parallel", "parallel"),
            vmem_limit_bytes=32 * 1024 * 1024),
    )(x3, params, b_psi)

    if hw_final != hw:
        out = out[:, :, :hw]
    return out.reshape(n, c_in, h, w)


def init_attention_gate_params(key, channel_in, channel_out):
    """Deterministic params in PyTorch Conv2d layouts.

    theta/phi: (Cout, Cin, 1, 1) + (Cout,);  psi: (1, Cout, 1, 1) + (1,).
    """
    def conv1x1(key, c_in, c_out):
        kw, kb = jax.random.split(key)
        bound = 1.0 / jnp.sqrt(c_in)
        w = jax.random.uniform(kw, (c_out, c_in, 1, 1), jnp.float32, -bound, bound)
        b = jax.random.uniform(kb, (c_out,), jnp.float32, -bound, bound)
        return w, b

    k1, k2, k3 = jax.random.split(key, 3)
    w_th, b_th = conv1x1(k1, channel_in, channel_out)
    w_ph, b_ph = conv1x1(k2, channel_in, channel_out)
    w_ps, b_ps = conv1x1(k3, channel_out, 1)
    return (w_th, b_th, w_ph, b_ph, w_ps, b_ps)


def _reference(x, g, torch_params):
    """Pure-JAX reference matching the PyTorch module line by line (no folding)."""
    del g  # unused by the original forward (phi_g is applied to x)
    w_th, b_th, w_ph, b_ph, w_ps, b_ps = torch_params

    def conv1x1(inp, w, b):
        y = jax.lax.conv_general_dilated(
            inp, w, window_strides=(1, 1), padding="VALID",
            dimension_numbers=("NCHW", "OIHW", "NCHW"))
        return y + b.reshape(1, -1, 1, 1)

    theta = conv1x1(x, w_th, b_th)
    phi = conv1x1(x, w_ph, b_ph)
    f = jnp.maximum(theta + phi, 0.0)
    psi = conv1x1(f, w_ps, b_ps)
    coef = jax.nn.sigmoid(psi)
    return x * coef


if __name__ == "__main__":
    key = jax.random.PRNGKey(0)
    key, kx, kg = jax.random.split(key, 3)

    N, C_in, H, W = 2, 4, 16, 16
    C_out = 8
    x = jax.random.normal(kx, (N, C_in, H, W), jnp.float32)
    g = jax.random.normal(kg, (N, C_in, H, W), jnp.float32)

    torch_params = init_attention_gate_params(key, C_in, C_out)
    kparams = prepare_kernel_params(torch_params)   # hoisted once, not per call

    out = attention_gate_forward(x, g, kparams)
    out = jax.block_until_ready(out)

    ref = _reference(x, g, torch_params)
    assert out.shape == (N, C_in, H, W), out.shape
    assert jnp.allclose(out, ref, atol=1e-5, rtol=1e-5), "mismatch vs reference"

    print("KERNEL_OK")
</pallas_src>

<mosaic_0001>
module attributes {stable_mosaic.version = 11 : i64} {
  func.func @_attention_gate_kernel(%arg0: i32, %arg1: i32, %arg2: memref<1x4x256xf32, #tpu.memory_space<vmem>>, %arg3: memref<8x6xf32, #tpu.memory_space<vmem>>, %arg4: memref<1xf32, #tpu.memory_space<smem>>, %arg5: memref<1x4x256xf32, #tpu.memory_space<vmem>>) attributes {dimension_semantics = [#tpu.dimension_semantics<parallel>, #tpu.dimension_semantics<parallel>], iteration_bounds = array<i64: 2, 1>, scalar_prefetch = 0 : i64, scratch_operands = 0 : i64, tpu.core_type = #tpu.core_type<tc>, window_params = [{transform_indices = @transform_0, window_bounds = array<i64: 1, 4, 256>}, {pipeline_mode = #tpu.pipeline_mode<synchronous>, transform_indices = @transform_1, window_bounds = array<i64: 8, 6>}, {transform_indices = @transform_2, window_bounds = array<i64: 1>}, {transform_indices = @transform_3, window_bounds = array<i64: 1, 4, 256>}]} {
    %c0 = arith.constant 0 : index
    %c0_0 = arith.constant 0 : index
    %c0_1 = arith.constant 0 : index
    %0 = vector.load %arg2[%c0, %c0_0, %c0_1] : memref<1x4x256xf32, #tpu.memory_space<vmem>>, vector<1x4x256xf32>
    %1 = vector.shape_cast %0 : vector<1x4x256xf32> to vector<4x256xf32>
    %c0_2 = arith.constant 0 : index
    %c0_3 = arith.constant 0 : index
    %2 = vector.load %arg3[%c0_2, %c0_3] : memref<8x6xf32, #tpu.memory_space<vmem>>, vector<8x4xf32>
    %c0_4 = arith.constant 0 : index
    %c4 = arith.constant 4 : index
    %3 = vector.load %arg3[%c0_4, %c4] : memref<8x6xf32, #tpu.memory_space<vmem>>, vector<8x1xf32>
    %c0_5 = arith.constant 0 : index
    %c5 = arith.constant 5 : index
    %4 = vector.load %arg3[%c0_5, %c5] : memref<8x6xf32, #tpu.memory_space<vmem>>, vector<8x1xf32>
    %cst = arith.constant dense<0.000000e+00> : vector<8x256xf32>
    %5 = tpu.matmul %2, %1, %cst {dimension_numbers = #tpu.dot_dimension_numbers<[1], [0], [0], [1], [0, 0, 1, 1], [], []>} : vector<8x4xf32>, vector<4x256xf32>, vector<8x256xf32> -> vector<8x256xf32>
    %6 = vector.broadcast %3 : vector<8x1xf32> to vector<8x256xf32>
    %7 = arith.addf %5, %6 : vector<8x256xf32>
    %cst_6 = arith.constant 0.000000e+00 : f32
    %8 = vector.broadcast %cst_6 : f32 to vector<8x256xf32>
    %9 = arith.maximumf %7, %8 : vector<8x256xf32>
    %10 = vector.broadcast %4 : vector<8x1xf32> to vector<8x256xf32>
    %11 = arith.mulf %9, %10 : vector<8x256xf32>
    %cst_7 = arith.constant dense<0.000000e+00> : vector<256xf32>
    %12 = vector.multi_reduction <add>, %11, %cst_7 [0] : vector<8x256xf32> to vector<256xf32>
    %13 = vector.shape_cast %12 : vector<256xf32> to vector<1x256xf32>
    %c0_8 = arith.constant 0 : index
    %14 = memref.load %arg4[%c0_8] : memref<1xf32, #tpu.memory_space<smem>>
    %15 = vector.broadcast %14 : f32 to vector<1x256xf32>
    %16 = arith.addf %13, %15 : vector<1x256xf32>
    %cst_9 = arith.constant 0.000000e+00 : f32
    %17 = vector.broadcast %cst_9 : f32 to vector<1x256xf32>
    %18 = arith.subf %17, %16 : vector<1x256xf32>
    %19 = math.exp %18 : vector<1x256xf32>
    %cst_10 = arith.constant 1.000000e+00 : f32
    %20 = vector.broadcast %cst_10 : f32 to vector<1x256xf32>
    %21 = arith.addf %20, %19 : vector<1x256xf32>
    %22 = tpu.reciprocal %21 : vector<1x256xf32> -> vector<1x256xf32>
    %23 = vector.broadcast %22 : vector<1x256xf32> to vector<4x256xf32>
    %24 = arith.mulf %1, %23 : vector<4x256xf32>
    %c0_11 = arith.constant 0 : index
    %c0_12 = arith.constant 0 : index
    %c0_13 = arith.constant 0 : index
    %25 = vector.load %arg5[%c0_11, %c0_12, %c0_13] : memref<1x4x256xf32, #tpu.memory_space<vmem>>, vector<1x4x256xf32>
    %26 = vector.shape_cast %25 : vector<1x4x256xf32> to vector<4x256xf32>
    %27 = vector.shape_cast %24 : vector<4x256xf32> to vector<1x4x256xf32>
    tpu.vector_store %arg5[%c0_11, %c0_12, %c0_13], %27 {strides = array<i32>} : memref<1x4x256xf32, #tpu.memory_space<vmem>>, vector<1x4x256xf32>,
    return
  }
  func.func @transform_0(%arg0: i32, %arg1: i32) -> (i32, i32, i32) {
    %c0_i32 = arith.constant 0 : i32
    %c0_i32_0 = arith.constant 0 : i32
    return %arg0, %c0_i32, %arg1 : i32, i32, i32
  }
  func.func @transform_1(%arg0: i32, %arg1: i32) -> (i32, i32) {
    %c0_i32 = arith.constant 0 : i32
    %c0_i32_0 = arith.constant 0 : i32
    %c0_i32_1 = arith.constant 0 : i32
    return %c0_i32, %c0_i32_0 : i32, i32
  }
  func.func @transform_2(%arg0: i32, %arg1: i32) -> i32 {
    %c0_i32 = arith.constant 0 : i32
    %c0_i32_0 = arith.constant 0 : i32
    return %c0_i32 : i32
  }
  func.func @transform_3(%arg0: i32, %arg1: i32) -> (i32, i32, i32) {
    %c0_i32 = arith.constant 0 : i32
    %c0_i32_0 = arith.constant 0 : i32
    return %arg0, %c0_i32, %arg1 : i32, i32, i32
  }
}

</mosaic_0001>

<bundles_post_ra>
// kernel: tpu_custom_call.1
= control target key start
LH: loop header
LB: loop body
LE: loop exit
PB: predicated region body
PF: predicated region fallthrough
CT: control target
= control target key end

     0   :  { %s964_s0 = inlined_call_operand.hbm [shape: f32[2,4,256], index: 0, kind: input, shape index: {}]   ;;  %s965_s1 = inlined_call_operand.hbm [shape: f32[8,6], index: 1, kind: input, shape index: {}]   ;;  %s966_s2 = inlined_call_operand.<no memory space> [shape: f32[1], index: 2, kind: input, shape index: {}]   ;;  %s967_s3 = inlined_call_operand.hbm [shape: f32[2,4,256], index: 3, kind: output, shape index: {}]  }
   0x1   :  { %8 = sst [smem:[#allocation2]] %s966_s2 }
   0x2   :  { %9 = vsyncpa [#allocation4], 0 }
   0x3   :  { %11 = vsyncpa [#allocation4 + $0x1], 0 }
   0x4   :  { %12 = vsyncpa [#allocation7], 0 }
   0x5   :  { %13 = vsyncpa [#allocation5], 0 }
   0x6   :  { %15 = vsyncpa [#allocation5 + $0x1], 0  ;;  %s744_s14 = smov 0   ;;  %s746_s15 = smov 0  }
   0x7   :  { %s748_s16 = smov 0   ;;  %s750_s17 = smov 0  }
   0x8   :  { %s752_s18 = smov 0   ;;  %s754_s19 = smov 0  }
   0x9 LB: > { %s460_s2 = sadd.s32 4294967295, %s713_s19   ;;  %s461_s20 = sadd.s32 4294967294, %s713_s19   ;;  %s713_s19 = sphi %s754_s19, %s21_s19   ;;  %s709_s18 = sphi %s752_s18, %s992_s18   ;;  %s705_s17 = sphi %s750_s17, %s991_s17   ;;  %s701_s16 = sphi %s748_s16, %s990_s16   ;;  %s697_s15 = sphi %s746_s15, %s989_s15   ;;  %s693_s14 = sphi %s744_s14, %s988_s14  }
   0xa   : > { %p55_p0 = scmp.ne.s32.totalorder %s697_s15, %s693_s14  ;;  %p778_p1 = scmp.eq.s32.totalorder %s460_s2, 0 }
   0xb   : > { %p782_p2 = scmp.eq.s32.totalorder %s460_s2, 1  ;;  %p129_p3 = scmp.eq.s32.totalorder %s461_s20, 1 }
   0xc   : > { %s972_s21 = scalar_select %p778_p1, 1, 0 }
   0xd   : > { %s973_s22 = scalar_select %p782_p2, 1, 0 }
   0xe   : > { %p788_p4 = por %p778_p1, %p55_p0  ;;  %p462_p5 = scmp.ge.s32.totalorder %s713_s19, 1 }
   0xf   : > { %p793_p6 = por %p129_p3, %p55_p0  ;;  %p136_p7 = scmp.lt.s32.totalorder %s713_s19, 3 }
  0x10   : > { %s974_s23 = scalar_select %p788_p4, 1, 0 }
  0x11   : > { %s975_s24 = scalar_select %p793_p6, 1, 0 }
  0x12   : > { %p798_p8 = pnand %p462_p5, %p136_p7  ;;  %s715_s26 = smov [#allocation6]  }
  0x13   : > { %s149_s27 = sshll.u32 %s715_s26, 4  ;;  %s33_s29 = sadd.s32 1, %s709_s18  ;;  %s150_s27 = int_to_ptr.vmem [resolvable:$true] %s149_s27 }
  0x14   : > { %s976_s25 = scalar_select %p798_p8, 1, 0 }
  0x15   : > { %p490_p10 = pneg %p798_p8  ;;  %s42_s30 = sadd.s32 1, %s701_s16 }
  0x16   : > { %p813_p12 = scmp.ge.s32.totalorder %s33_s29, 2  ;;  %s569_s7 = scalar_lea.hbm %s965_s1, 128 }
  0x17   : > { %p807_p11 = pnand %p490_p10, %p778_p1  ;;  %p570_p13 = scmp.ne.s32.totalorder %s965_s1, %s569_s7 }
  0x18   : > { %s978_s4 = scalar_select %p813_p12, 1, 0 }
  0x19   : > { %p571_p0 = pneg %p807_p11  ;;  %p576_p7 = scmp.lt.u32.totalorder %s569_s7, %s965_s1 }
  0x1b   : > { %p572_p3 = pnand %p571_p0, %p570_p13 }
  0x1d   : > { %p573_p5 = pneg %p572_p3 }
  0x1f   : > { %p578_p10 = pnand %p576_p7, %p573_p5 }
  0x21   : > { %581 = shalt.err (!%p578_p10)
}
  0x22   : > { %s582_s12 = scalar_lea.vmem %s150_s27, 128  ;;  %p590_p4 = scmp.lt.s32.totalorder %s150_s27, %s150_s27 }
  0x23   : > { %p583_p9 = scmp.ne.s32.totalorder %s150_s27, %s582_s12  ;;  %p591_p8 = scmp.lt.s32.totalorder %s582_s12, %s582_s12 }
  0x25   : > { %p585_p6 = pnand %p583_p9, %p571_p0  ;;  %p592_p2 = por %p591_p8, %p590_p4 }
  0x27   : > { %p586_p1 = pneg %p585_p6 }
  0x29   : > { %p593_p12 = pnand %p592_p2, %p586_p1 }
  0x2b   : > { %596 = shalt.err (!%p593_p12)
}
  0x2c   : > { %493 = dma.hbm_to_vmem [thread:$0]  (!%p807_p11), %s965_s1, 128, %s150_s27, [#allocation7]  }
  0x2d   : > { %p979_p4 = scmp.ne.s32.totalorder %s978_s4, 0  ;;  %p49_p1 = scmp.ne.s32.totalorder %s701_s16, %s697_s15 }
  0x2e   : > { %p50_p2 = scmp.eq.s32.totalorder %s713_s19, 0  ;;  %p503_p6 = scmp.lt.s32.totalorder %s713_s19, 2 }
  0x2f   : > { %s994_s29 = smov (%p979_p4, %s33_s29), 0  ;;  %p980_p12 = scmp.ne.s32.totalorder %s973_s22, 0 }
  0x30   : > { %s37_s20 = ssub.s32 %s709_s18, %s994_s29  ;;  %p51_p9 = por %p50_p2, %p49_p1 }
  0x31   : > { %p40_p8 = scmp.eq.s32.totalorder %s37_s20, 0  ;;  %p845_p13 = por %p980_p12, %p49_p1 }
  0x32   : > { %s163_s28 = sand.u32 1, %s701_s16   ;;  %s480_s4 = sshll.u32 %s709_s18, 7 }
  0x33   : > { %s853_s5 = scalar_select %p40_p8, %s701_s16, %s42_s30  }
  0x34   : > { %s465_s27 = sshll.u32 %s163_s28, 3  ;;  %s859_s8 = scalar_lea.hbm %s964_s0, %s480_s4 }
  0x35   : > { %s167_s22 = scalar_lea.vmem [#allocation3], %s465_s27  ;;  %p863_p11 = pnand %p503_p6, %p51_p9 }
  0x36   : > { %s177_s9 = sshll.u32 %s167_s22, 4  ;;  %s164_s30 = scalar_lea.sflag [#allocation4], %s163_s28  ;;  %s861_s9 = int_to_ptr.vmem [resolvable:$true] %s177_s9 }
  0x37   : > { %s597_s11 = scalar_lea.hbm %s859_s8, 128  ;;  %p599_p3 = pneg %p863_p11 }
  0x38   : > { %p598_p0 = scmp.ne.s32.totalorder %s859_s8, %s597_s11  ;;  %s602_s2 = scalar_lea.hbm %s964_s0, 256 }
  0x39   : > { %p603_p10 = scmp.lt.u32.totalorder %s859_s8, %s964_s0  ;;  %p604_p4 = scmp.lt.u32.totalorder %s602_s2, %s597_s11 }
  0x3a   : > { %p600_p5 = pnand %p599_p3, %p598_p0  ;;  %p606_p2 = scmp.lt.u32.totalorder %s597_s11, %s859_s8 }
  0x3b   : > { %p605_p1 = por %p604_p4, %p603_p10 }
  0x3c   : > { %p601_p7 = pneg %p600_p5 }
  0x3d   : > { %p607_p6 = por %p606_p2, %p605_p1 }
  0x3f   : > { %p608_p8 = pnand %p607_p6, %p601_p7 }
  0x41   : > { %611 = shalt.err (!%p608_p8)
}
  0x42   : > { %s612_s28 = scalar_lea.vmem %s861_s9, 128  ;;  %s716_s4 = smov [#allocation3]  }
  0x43   : > { %p613_p9 = scmp.ne.s32.totalorder %s861_s9, %s612_s28  ;;  %s617_s6 = sshll.u32 %s716_s4, 4  ;;  %s618_s6 = int_to_ptr.vmem [resolvable:$false] %s617_s6 }
  0x44   : > { %s619_s7 = scalar_lea.vmem %s618_s6, 256  ;;  %p620_p5 = scmp.lt.s32.totalorder %s861_s9, %s618_s6 }
  0x45   : > { %p615_p12 = pnand %p613_p9, %p599_p3  ;;  %p621_p10 = scmp.lt.s32.totalorder %s619_s7, %s612_s28 }
  0x47   : > { %p616_p0 = pneg %p615_p12  ;;  %p622_p4 = por %p621_p10, %p620_p5 }
  0x49   : > { %p623_p1 = pnand %p622_p4, %p616_p0 }
  0x4b   : > { %626 = shalt.err (!%p623_p1)
}
  0x4c   : > { %497 = dma.hbm_to_vmem [thread:$0]  (!%p863_p11), %s859_s8, 128, %s861_s9, %s164_s30  }
  0x4d   : > { %p983_p7 = scmp.ne.s32.totalorder %s976_s25, 0 }
  0x4e   : > { %s895_s22 = sand.u32 (!%p983_p7), 1, %s697_s15   ;;  %p984_p3 = scmp.ne.s32.totalorder (!%p983_p7), %s974_s23, 0 }
  0x4f   : > { %186 = sbr.rel (%p983_p7) target bundleno = 374 (0x176), region = 32  ;;  %s469_s11 = sshll.u32 (!%p983_p7), %s895_s22, 3 }
  0x50   : > { %s189_s12 = scalar_lea.sflag (!%p983_p7), [#allocation4], %s895_s22  ;;  %s192_s13 = scalar_lea.vmem (!%p983_p7), [#allocation3], %s469_s11 }
  0x56   : > { %680 = dma.done.wait (%p984_p3), %s189_s12, 128  }
  0x57   : > { %682 = vsyncadd (%p984_p3), %s189_s12, 4294967168  ;;  %p985_p11 = scmp.ne.s32.totalorder %s972_s21, 0 }
  0x59   : > { %684 = dma.done.wait (%p985_p11), [#allocation7], 128  }
  0x5a   : > { %686 = vsyncadd (%p985_p11), [#allocation7], 4294967168  ;;  %v717_v0 = vmov 0.0   ;;  %v718_v1 = vmov 4   ;;  %v221_v2 = vld [vmem:[%s192_s13] sm:$0xff]  ;;  %vm233_vm0 = vcmask 1043456  }
  0x5b   : > { %302 = vmatprep.mubr.f32.mxu0 %v717_v0  ;;  %558 = vset.pattern.permute.xlu0 %v718_v1  ;;  %v222_v3 = vld [vmem:[#allocation6] sm:$0xff]  ;;  %v229_v4 = vcombine.high %v221_v2, %v221_v2  ;;  %vm230_vm1 = vcmask 31744   ;;  %v719_v5 = vmov 5   ;;  %s329_s21 = sld [smem:[#allocation2]]  ;;  %s481_s23 = sshll.u32 %s705_s17, 7 }
  0x5c   : > { %225 = vperm.xlu0 %558, %v222_v3   ;;  %s218_s25 = scalar_lea.vmem [#allocation8], %s469_s11  ;;  %s915_s30 = scalar_lea.hbm %s967_s3, %s481_s23 }
  0x5d   : > { %472 = vmatprep.subr.msk.mxu0 %vm233_vm0, %v229_v4  ;;  %s366_s8 = sshll.u32 %s218_s25, 4  ;;  %s350_s2 = scalar_lea.sflag [#allocation5], %s895_s22  ;;  %s917_s8 = int_to_ptr.vmem [resolvable:$true] %s366_s8 }
  0x5e   : > { %473 = vmatpush1.msk.msra.mxu0 %vm233_vm0, %v221_v2  ;;  %s627_s20 = scalar_lea.vmem %s917_s8, 128  ;;  %s720_s17 = smov [#allocation8]  }
  0x5f   : > { %474 = vmatmul.mubr.msk.f32.vlgmr.msra.gmra.mrb[0].mxu0 %vm230_vm1, %v222_v3  ;;  %p628_p2 = scmp.ne.s32.totalorder %s917_s8, %s627_s20  ;;  %s631_s27 = sshll.u32 %s720_s17, 4  ;;  %s632_s27 = int_to_ptr.vmem [resolvable:$false] %s631_s27 }
  0x60   : > { %559 = vset.pattern.permute.xlu0 %v719_v5  ;;  %s633_s28 = scalar_lea.vmem %s632_s27, 256  ;;  %p634_p9 = scmp.lt.s32.totalorder %s917_s8, %s632_s27 }
  0x61   : > { %312 = vperm.xlu0 %559, %v222_v3   ;;  %v330_v25 = vstv %s329_s21  ;;  %p629_p6 = pnand %p628_p2, %p845_p13  ;;  %p635_p12 = scmp.lt.s32.totalorder %s633_s28, %s627_s20 }
  0x63   : > { %p630_p8 = pneg %p629_p6  ;;  %p636_p0 = por %p635_p12, %p634_p9 }
  0x65   : > { %p637_p5 = pnand %p636_p0, %p630_p8 }
  0xdb   : > { %v226_v6 = vpop.permute.xlu0 %225 }
  0xe0   : > { %v313_v11 = vpop.permute.xlu0 %312 }
 0x132   : > { %v304_v7 = vpop.f32.mrb[0].mxu0 }
 0x133   : > { %v305_v8 = vadd.f32 %v304_v7, %v226_v6  ;;  %v306_v9 = vpop.f32.mrb[1].mxu0 }
 0x134   : > { %v307_v10 = vadd.f32 %v306_v9, %v226_v6 }
 0x135   : > { %v309_v12 = vmax.f32 %v305_v8, 0.0 }
 0x136   : > { %v310_v13 = vmax.f32 %v307_v10, 0.0 }
 0x137   : > { %v315_v14 = vmul.f32 %v313_v11, %v309_v12 }
 0x138   : > { %v316_v15 = vmul.f32 %v313_v11, %v310_v13 }
 0x139   : > { %v317_v16 = vrot.slane %v315_v14, 4 }
 0x13a   : > { %v323_v17 = vrot.slane %v316_v15, 4 }
 0x13b   : > { %v318_v18 = vadd.f32 %v317_v16, %v315_v14 }
 0x13c   : > { %v324_v19 = vadd.f32 %v323_v17, %v316_v15 }
 0x13d   : > { %v319_v20 = vrot.slane %v318_v18, 2 }
 0x13e   : > { %v325_v21 = vrot.slane %v324_v19, 2 }
 0x13f   : > { %v320_v22 = vadd.f32 %v319_v20, %v318_v18 }
 0x140   : > { %v326_v23 = vadd.f32 %v325_v21, %v324_v19 }
 0x141   : > { %v321_v24 = vrot.slane %v320_v22, 1 }
 0x142   : > { %v327_v26 = vrot.slane %v326_v23, 1 }
 0x143   : > { %v322_v27 = vadd.f32 %v321_v24, %v320_v22 }
 0x144   : > { %v328_v28 = vadd.f32 %v327_v26, %v326_v23 }
 0x145   : > { %v331_v29 = vadd.f32 %v330_v25, %v322_v27 }
 0x146   : > { %v332_v30 = vadd.f32 %v330_v25, %v328_v28 }
 0x147   : > { %v333_v31 = vsub.f32 0.0, %v331_v29 }
 0x148   : > { %v334_v32 = vsub.f32 0.0, %v332_v30 }
 0x149   : > { %v335_v33 = vmul.f32 1.442695, %v333_v31 }
 0x14a   : > { %v337_v34 = vmul.f32 1.442695, %v334_v32 }
 0x14b   : > { %561 = vpow2.f32 %v335_v33 }
 0x14c   : > { %563 = vpow2.f32 %v337_v34 }
 0x155   : > { %v562_v35 = vpop.eup %561 }
 0x156   : > { %v564_v36 = vpop.eup %563  ;;  %v339_v37 = vadd.f32 1.0, %v562_v35 }
 0x157   : > { %v340_v38 = vadd.f32 1.0, %v564_v36 }
 0x158   : > { %565 = vrcp.f32 %v339_v37 }
 0x159   : > { %567 = vrcp.f32 %v340_v38 }
 0x162   : > { %v566_v39 = vpop.eup %565 }
 0x163   : > { %v568_v40 = vpop.eup %567 }
 0x164   : > { %v345_v41 = vcombine.low %v566_v39, %v568_v40 }
 0x166   : > { %v347_v42 = vmul.f32 %v345_v41, %v221_v2 }
 0x168   : > { %348 = vst [vmem:[%s218_s25] sm:$0xff] %v347_v42 }
 0x169   : > { %640 = shalt.err (!%p637_p5)
}
 0x16a   : > { %s641_s4 = scalar_lea.hbm %s915_s30, 128  ;;  %s645_s22 = scalar_lea.hbm %s967_s3, 256 }
 0x16b   : > { %p642_p10 = scmp.ne.s32.totalorder %s915_s30, %s641_s4  ;;  %p646_p7 = scmp.lt.u32.totalorder %s915_s30, %s967_s3 }
 0x16c   : > { %p647_p3 = scmp.lt.u32.totalorder %s645_s22, %s641_s4  ;;  %p649_p2 = scmp.lt.u32.totalorder %s641_s4, %s915_s30 }
 0x16d   : > { %p643_p4 = pnand %p642_p10, %p845_p13 }
 0x16e   : > { %p648_p11 = por %p647_p3, %p646_p7 }
 0x16f   : > { %p644_p1 = pneg %p643_p4 }
 0x170   : > { %p650_p6 = por %p649_p2, %p648_p11 }
 0x172   : > { %p651_p8 = pnand %p650_p6, %p644_p1 }
 0x174   : > { %654 = shalt.err (!%p651_p8)
}
 0x175   : > { %488 = dma.vmem_to_hbm [thread:$0]  (%p845_p13), %s917_s8, 128, %s915_s30, %s350_s2  }
 0x176 PF: > { %s378_s13 = sand.u32 1, %s693_s14   ;;  %p986_p9 = scmp.ne.s32.totalorder %s975_s24, 0 }
 0x177   : > { %p987_p12 = scmp.ge.s32.totalorder %s713_s19, 2  ;;  %s379_s21 = scalar_lea.sflag [#allocation5], %s378_s13 }
 0x179   : > { %p499_p0 = pnand %p987_p12, %p986_p9 }
 0x17b   : > { %688 = dma.done.wait (!%p499_p0), %s379_s21, 128  }
 0x17c   : > { %690 = vsyncadd (!%p499_p0), %s379_s21, 4294967168  ;;  %s21_s19 = sadd.s32 1, %s713_s19   ;;  %s988_s14 = smov %s697_s15 }
 0x17d   : > { %p18_p5 = scmp.ge.s32.totalorder %s21_s19, 4   ;;  %s989_s15 = smov %s701_s16 }
 0x17e   : > { %s990_s16 = smov %s853_s5  ;;  %s991_s17 = smov %s709_s18 }
 0x17f   : > { %s992_s18 = smov %s994_s29  ;;  %20 = sbr.rel (!%p18_p5) target bundleno = 9 (0x9), region = 81 }
 0x186   :  { %384 = vsyncpa [#allocation4], 1 }
 0x187   :  { %386 = vsyncpa [#allocation4 + $0x1], 1 }
 0x188   :  { %387 = vsyncpa [#allocation7], 1 }
 0x189   :  { %388 = vsyncpa [#allocation5], 1 }
 0x18a   :  { %390 = vsyncpa [#allocation5 + $0x1], 1 }

</bundles_post_ra>
